<compile_context>
chip_gen: v7x
topology: tpu7x:2x2x1
jax: 0.10.0
libtpu: 0.0.40
codegen_flags: <defaults>
</compile_context>

<pallas_src>
import math

import jax
import jax.numpy as jnp
from jax.experimental import pallas as pl
from jax.experimental.pallas import tpu as pltpu


def _choose_pack(L, d_model):
    """Smallest P with P | L and (P * d_model) % 128 == 0, i.e. packed output rows are
    exactly lane-dense.  Falls back to P = 1 (unpadded output, masked stores)."""
    for p in range(1, min(L, 32) + 1):
        if L % p == 0 and (p * d_model) % 128 == 0:
            return p
    return 1


def _vmem_capacity_bytes():
    try:
        return int(pltpu.get_tpu_info().vmem_capacity_bytes)
    except Exception:
        return 64 * 1024 * 1024  # conservative default: v7x per-TensorCore VMEM


def _choose_block_batch(B, L, C, D, vmem_cap, target_rows=4096):
    """Batch-tile size Bt.

    Conservative per-batch-element VMEM estimate (all potentially-live values):
      double-buffered f32 x tile (8*L*C) + two group-rolled f32 copies (8*L*C)
      + three bf16 casts (6*L*C) + double-buffered f32 out tile (8*L*D) + f32 acc (4*L*D).
    """
    bytes_per_b = L * (22 * C + 12 * D)
    budget = max(int(0.35 * vmem_cap), 4 * 1024 * 1024)
    bt = max(1, min(B, budget // max(bytes_per_b, 1)))

    nb = -(-B // bt)
    # Prefer >= 2 grid blocks so the "parallel" batch axis shards across dual-TensorCore
    # parts (v7x) -- but only if each block still amortizes the ~0.35 us step overhead.
    # On single-core parts (v5e/v6e) a single block is kept when it fits.
    if nb == 1 and B >= 2 and ((B + 1) // 2) * L >= target_rows:
        bt = (B + 1) // 2
        nb = -(-B // bt)
    # Prefer an even block count (even split across two cores) when it is free.
    if nb > 1 and nb % 2 == 1:
        bt_even = -(-B // (nb + 1))
        if bt_even * L >= target_rows and (-(-B // bt_even)) % 2 == 0:
            bt = bt_even
    return bt


def _build_packed_weights(conv_weight, P, C, d_model, dtype=jnp.bfloat16):
    """conv_weight (d_model, C, 3) -> three (P*C, P*d_model) matrices.

    Per-tap matrices Wk = conv_weight[:, :, k].T give
        out[l] = x[l-1] @ W0 + x[l] @ W1 + x[l+1] @ W2   (circular in l).
    w_main carries every tap that stays inside a pack-group (block-banded);
    w_prev / w_next carry the two taps that cross the group boundary and are applied to the
    group-rolled inputs (zero everywhere except one (C, d_model) block)."""
    w = jnp.transpose(conv_weight, (2, 1, 0)).astype(jnp.float32)  # (3, C, D)
    Kp, Np = P * C, P * d_model

    w_main = jnp.zeros((Kp, Np), jnp.float32)
    for q in range(P):
        w_main = w_main.at[q * C:(q + 1) * C, q * d_model:(q + 1) * d_model].set(w[1])
        if q >= 1:
            w_main = w_main.at[(q - 1) * C:q * C, q * d_model:(q + 1) * d_model].set(w[0])
        if q + 1 < P:
            w_main = w_main.at[(q + 1) * C:(q + 2) * C, q * d_model:(q + 1) * d_model].set(w[2])

    w_prev = jnp.zeros((Kp, Np), jnp.float32).at[(P - 1) * C:P * C, 0:d_model].set(w[0])
    w_next = jnp.zeros((Kp, Np), jnp.float32).at[0:C, (P - 1) * d_model:P * d_model].set(w[2])

    return jnp.stack([w_main, w_prev, w_next]).astype(dtype)  # (3, Kp, Np)


def patch_emb_kernel(x_ref, w_ref, pos_ref, o_ref):
    # x_ref:   (Bt, G, P*C)        float32   -- P sequence positions packed per row
    # w_ref:   (3, P*C, P*D)       bfloat16  -- [within-group taps, prev-group W0, next-group W2]
    # pos_ref: (G, P*D)            float32   -- packed learned position embedding
    # o_ref:   (Bt, G, P*D)        float32   -- lane-dense packed output
    bt, g, kp = x_ref.shape
    n_out = o_ref.shape[-1]

    xf = x_ref[...]
    # Boundary taps of the circular conv come from the previous / next pack-group's row
    # (sublane roll along the group axis per batch row -> XLU; wrap gives circularity).
    x_prev = pltpu.roll(xf, shift=1, axis=1)
    x_next = pltpu.roll(xf, shift=g - 1, axis=1)

    xm = xf.reshape(bt * g, kp).astype(jnp.bfloat16)
    xp = x_prev.reshape(bt * g, kp).astype(jnp.bfloat16)
    xn = x_next.reshape(bt * g, kp).astype(jnp.bfloat16)

    # Single f32 accumulator; bf16 operands, f32 MXU accumulation.
    acc = jnp.dot(xm, w_ref[0], preferred_element_type=jnp.float32)
    acc = acc + jnp.dot(xp, w_ref[1], preferred_element_type=jnp.float32)
    acc = acc + jnp.dot(xn, w_ref[2], preferred_element_type=jnp.float32)

    # Fused learned position embedding (broadcast over the batch-tile dim).
    # TODO(synk): nn.Dropout(0.1) on the position embeddings is training-only randomness;
    #             treated as identity (eval mode) here.
    out = acc.reshape(bt, g, n_out) + pos_ref[...][None, :, :]
    o_ref[...] = out.astype(o_ref.dtype)


def patch_emb(x, conv_weight, pos_table):
    """Forward pass of Patch_Emb (eval mode).

    x:           (B, L, C) float32, C = c_in * patch_len
    conv_weight: (d_model, C, 3) float32 (PyTorch Conv1d weight layout)
    pos_table:   (max_seq_len, d_model) float32 (nn.Embedding weight)
    returns:     (B, L, d_model) float32
    """
    B, L, C = x.shape
    d_model = conv_weight.shape[0]
    assert conv_weight.shape == (d_model, C, 3)
    assert pos_table.shape[0] >= L and pos_table.shape[1] == d_model

    P = _choose_pack(L, d_model)
    G = L // P
    Kp, Np = P * C, P * d_model

    w_all = _build_packed_weights(conv_weight, P, C, d_model)        # (3, Kp, Np) bf16
    pos_packed = pos_table[:L].astype(jnp.float32).reshape(G, Np)    # contiguous (free)
    x_packed = x.reshape(B, G, Kp)                                   # contiguous (free)

    vmem_cap = _vmem_capacity_bytes()
    bt = _choose_block_batch(B, L, C, d_model, vmem_cap)
    grid = (pl.cdiv(B, bt),)   # ragged last block handled by Pallas block masking

    out_packed = pl.pallas_call(
        patch_emb_kernel,
        out_shape=jax.ShapeDtypeStruct((B, G, Np), jnp.float32),
        grid_spec=pltpu.PrefetchScalarGridSpec(
            num_scalar_prefetch=0,
            grid=grid,
            in_specs=[
                pl.BlockSpec((bt, G, Kp), lambda b: (b, 0, 0)),
                pl.BlockSpec((3, Kp, Np), lambda b: (0, 0, 0)),   # grid-invariant weights
                pl.BlockSpec((G, Np), lambda b: (0, 0)),          # grid-invariant pos table
            ],
            out_specs=pl.BlockSpec((bt, G, Np), lambda b: (b, 0, 0)),
        ),
        compiler_params=pltpu.CompilerParams(
            dimension_semantics=("parallel",),
            vmem_limit_bytes=min(int(0.75 * vmem_cap), 96 * 1024 * 1024),
        ),
    )(x_packed, w_all, pos_packed)

    # Un-pack: (B, G, P*d_model) -> (B, L, d_model); contiguous reshape (free, no slice).
    return out_packed.reshape(B, L, d_model)


def reference(x, conv_weight, pos_table):
    """Pure-JAX f32 reference of Patch_Emb.forward (eval mode)."""
    L = x.shape[1]
    w = jnp.transpose(conv_weight, (2, 1, 0))  # (3, C, D)
    x_prev = jnp.roll(x, shift=1, axis=1)
    x_next = jnp.roll(x, shift=-1, axis=1)
    val = (
        jnp.einsum("blc,cd->bld", x_prev, w[0])
        + jnp.einsum("blc,cd->bld", x, w[1])
        + jnp.einsum("blc,cd->bld", x_next, w[2])
    )
    return val + pos_table[None, :L, :]


if __name__ == "__main__":
    # Small shapes consistent with the module.
    c_in, patch_len, d_model = 4, 12, 32
    B, L = 4, 16
    C = c_in * patch_len  # 48 (Conv1d in_channels)
    max_seq_len = 64      # small stand-in for the module's 5000

    key = jax.random.PRNGKey(0)
    kx, kw, kp = jax.random.split(key, 3)

    x = jax.random.normal(kx, (B, L, C), dtype=jnp.float32)

    # Deterministic kaiming_normal_(mode='fan_in', nonlinearity='leaky_relu') for the
    # Conv1d weight of shape (d_model, C, 3): fan_in = C * 3.
    negative_slope = 0.01
    gain = math.sqrt(2.0 / (1.0 + negative_slope ** 2))
    std = gain / math.sqrt(C * 3)
    conv_weight = std * jax.random.normal(kw, (d_model, C, 3), dtype=jnp.float32)

    # nn.Embedding default init ~ N(0, 1).
    pos_table = jax.random.normal(kp, (max_seq_len, d_model), dtype=jnp.float32)

    out = jax.jit(patch_emb)(x, conv_weight, pos_table)
    out = jax.block_until_ready(out)

    ref = reference(x, conv_weight, pos_table)
    assert out.shape == (B, L, d_model)
    err = float(jnp.max(jnp.abs(out - ref)))
    # bf16 operands / f32 accumulation -> small, bounded deviation from the f32 reference.
    assert jnp.allclose(out, ref, atol=3e-2, rtol=3e-2), f"max abs err {err}"

    print("KERNEL_OK")
</pallas_src>

<mosaic_0001>
module attributes {stable_mosaic.version = 11 : i64} {
  func.func @patch_emb_kernel(%arg0: i32, %arg1: memref<4x4x192xf32, #tpu.memory_space<vmem>>, %arg2: memref<3x192x128xbf16, #tpu.memory_space<vmem>>, %arg3: memref<4x128xf32, #tpu.memory_space<vmem>>, %arg4: memref<4x4x128xf32, #tpu.memory_space<vmem>>) attributes {dimension_semantics = [#tpu.dimension_semantics<parallel>], iteration_bounds = array<i64: 1>, scalar_prefetch = 0 : i64, scratch_operands = 0 : i64, tpu.core_type = #tpu.core_type<tc>, window_params = [{transform_indices = @transform_0, window_bounds = array<i64: 4, 4, 192>}, {pipeline_mode = #tpu.pipeline_mode<synchronous>, transform_indices = @transform_1, window_bounds = array<i64: 3, 192, 128>}, {pipeline_mode = #tpu.pipeline_mode<synchronous>, transform_indices = @transform_2, window_bounds = array<i64: 4, 128>}, {transform_indices = @transform_3, window_bounds = array<i64: 4, 4, 128>}]} {
    %c0 = arith.constant 0 : index
    %c0_0 = arith.constant 0 : index
    %c0_1 = arith.constant 0 : index
    %0 = vector.load %arg1[%c0, %c0_0, %c0_1] : memref<4x4x192xf32, #tpu.memory_space<vmem>>, vector<4x4x192xf32>
    %c1_i32 = arith.constant 1 : i32
    %1 = tpu.dynamic_rotate %0 by %c1_i32 dim 1 : vector<4x4x192xf32>, i32 -> vector<4x4x192xf32>
    %c3_i32 = arith.constant 3 : i32
    %2 = tpu.dynamic_rotate %0 by %c3_i32 dim 1 : vector<4x4x192xf32>, i32 -> vector<4x4x192xf32>
    %3 = vector.shape_cast %0 : vector<4x4x192xf32> to vector<16x192xf32>
    %4 = arith.truncf %3 : vector<16x192xf32> to vector<16x192xbf16>
    %5 = vector.shape_cast %1 : vector<4x4x192xf32> to vector<16x192xf32>
    %6 = arith.truncf %5 : vector<16x192xf32> to vector<16x192xbf16>
    %7 = vector.shape_cast %2 : vector<4x4x192xf32> to vector<16x192xf32>
    %8 = arith.truncf %7 : vector<16x192xf32> to vector<16x192xbf16>
    %c0_2 = arith.constant 0 : index
    %c0_3 = arith.constant 0 : index
    %c0_4 = arith.constant 0 : index
    %9 = vector.load %arg2[%c0_2, %c0_3, %c0_4] : memref<3x192x128xbf16, #tpu.memory_space<vmem>>, vector<1x192x128xbf16>
    %10 = vector.shape_cast %9 : vector<1x192x128xbf16> to vector<192x128xbf16>
    %cst = arith.constant dense<0.000000e+00> : vector<16x128xf32>
    %11 = tpu.matmul %4, %10, %cst {dimension_numbers = #tpu.dot_dimension_numbers<[1], [0], [0], [1], [0, 0, 1, 1], [], []>} : vector<16x192xbf16>, vector<192x128xbf16>, vector<16x128xf32> -> vector<16x128xf32>
    %c1 = arith.constant 1 : index
    %c0_5 = arith.constant 0 : index
    %c0_6 = arith.constant 0 : index
    %12 = vector.load %arg2[%c1, %c0_5, %c0_6] : memref<3x192x128xbf16, #tpu.memory_space<vmem>>, vector<1x192x128xbf16>
    %13 = vector.shape_cast %12 : vector<1x192x128xbf16> to vector<192x128xbf16>
    %cst_7 = arith.constant dense<0.000000e+00> : vector<16x128xf32>
    %14 = tpu.matmul %6, %13, %cst_7 {dimension_numbers = #tpu.dot_dimension_numbers<[1], [0], [0], [1], [0, 0, 1, 1], [], []>} : vector<16x192xbf16>, vector<192x128xbf16>, vector<16x128xf32> -> vector<16x128xf32>
    %15 = arith.addf %11, %14 : vector<16x128xf32>
    %c2 = arith.constant 2 : index
    %c0_8 = arith.constant 0 : index
    %c0_9 = arith.constant 0 : index
    %16 = vector.load %arg2[%c2, %c0_8, %c0_9] : memref<3x192x128xbf16, #tpu.memory_space<vmem>>, vector<1x192x128xbf16>
    %17 = vector.shape_cast %16 : vector<1x192x128xbf16> to vector<192x128xbf16>
    %cst_10 = arith.constant dense<0.000000e+00> : vector<16x128xf32>
    %18 = tpu.matmul %8, %17, %cst_10 {dimension_numbers = #tpu.dot_dimension_numbers<[1], [0], [0], [1], [0, 0, 1, 1], [], []>} : vector<16x192xbf16>, vector<192x128xbf16>, vector<16x128xf32> -> vector<16x128xf32>
    %19 = arith.addf %15, %18 : vector<16x128xf32>
    %20 = vector.shape_cast %19 : vector<16x128xf32> to vector<4x4x128xf32>
    %c0_11 = arith.constant 0 : index
    %c0_12 = arith.constant 0 : index
    %21 = vector.load %arg3[%c0_11, %c0_12] : memref<4x128xf32, #tpu.memory_space<vmem>>, vector<4x128xf32>
    %22 = vector.shape_cast %21 : vector<4x128xf32> to vector<1x4x128xf32>
    %23 = vector.broadcast %22 : vector<1x4x128xf32> to vector<4x4x128xf32>
    %24 = arith.addf %20, %23 : vector<4x4x128xf32>
    %c0_13 = arith.constant 0 : index
    %c0_14 = arith.constant 0 : index
    %c0_15 = arith.constant 0 : index
    %25 = vector.load %arg4[%c0_13, %c0_14, %c0_15] : memref<4x4x128xf32, #tpu.memory_space<vmem>>, vector<4x4x128xf32>
    tpu.vector_store %arg4[%c0_13, %c0_14, %c0_15], %24 {strides = array<i32>} : memref<4x4x128xf32, #tpu.memory_space<vmem>>, vector<4x4x128xf32>,
    return
  }
  func.func @transform_0(%arg0: i32) -> (i32, i32, i32) {
    %c0_i32 = arith.constant 0 : i32
    %c0_i32_0 = arith.constant 0 : i32
    %c0_i32_1 = arith.constant 0 : i32
    return %arg0, %c0_i32, %c0_i32_0 : i32, i32, i32
  }
  func.func @transform_1(%arg0: i32) -> (i32, i32, i32) {
    %c0_i32 = arith.constant 0 : i32
    %c0_i32_0 = arith.constant 0 : i32
    %c0_i32_1 = arith.constant 0 : i32
    %c0_i32_2 = arith.constant 0 : i32
    return %c0_i32, %c0_i32_0, %c0_i32_1 : i32, i32, i32
  }
  func.func @transform_2(%arg0: i32) -> (i32, i32) {
    %c0_i32 = arith.constant 0 : i32
    %c0_i32_0 = arith.constant 0 : i32
    %c0_i32_1 = arith.constant 0 : i32
    return %c0_i32, %c0_i32_0 : i32, i32
  }
  func.func @transform_3(%arg0: i32) -> (i32, i32, i32) {
    %c0_i32 = arith.constant 0 : i32
    %c0_i32_0 = arith.constant 0 : i32
    %c0_i32_1 = arith.constant 0 : i32
    return %arg0, %c0_i32, %c0_i32_0 : i32, i32, i32
  }
}

</mosaic_0001>

<bundles_post_ra>
// kernel: patch_emb.1
= control target key start
LH: loop header
LB: loop body
LE: loop exit
PB: predicated region body
PF: predicated region fallthrough
CT: control target
= control target key end

     0   :  { %v742_v0 = vmov 0   ;;  %vm31_vm0 = vcmask 1047556   ;;  %vm269_vm1 = vcmask 523264   ;;  %vm90_vm2 = vcmask 1040384   ;;  %s1009_s1 = inlined_call_operand.vmem [shape: bf16[3,192,128], index: 1, kind: input, shape index: {}]   ;;  %s1010_s0 = inlined_call_operand.vmem [shape: f32[4,4,192], index: 0, kind: input, shape index: {}]   ;;  %s1011_s2 = inlined_call_operand.vmem [shape: f32[4,128], index: 2, kind: input, shape index: {}]   ;;  %s1012_s3 = inlined_call_operand.vmem [shape: f32[4,4,128], index: 3, kind: output, shape index: {}]  }
   0x1   :  { %389 = vmatprep.subr.bf16.mxu0 %v742_v0  ;;  %v698_v1 = vld [vmem:[%s1009_s1] sm:$0xff]   ;;  %273 = vmatprep.subr.bf16.mxu1 %v742_v0  ;;  %v699_v2 = vld [vmem:[%s1009_s1 + $0x8] sm:$0xff]   ;;  %v700_v3 = vld [vmem:[%s1009_s1 + $0x10] sm:$0xff]   ;;  %vm91_vm3 = vcmask 1044484   ;;  %vm119_vm4 = vcmask 1042432   ;;  %vm120_vm5 = vcmask 1046532  }
   0x2   :  { %390 = vmatpush1.bf16.msra.mxu0 %v698_v1  ;;  %v701_v4 = vld [vmem:[%s1009_s1 + $0x18] sm:$0xff]   ;;  %v702_v5 = vld [vmem:[%s1009_s1 + $0x20] sm:$0xff]   ;;  %v794_v8 = vld [vmem:[%s1010_s0 + $0x8] sm:$0xff] }
   0x3   :  { %391 = vmatprep.subr.bf16.mxu0 %v742_v0  ;;  %v710_v6 = vld [vmem:[%s1009_s1 + $0x60] sm:$0xff]   ;;  %v799_v9 = vld [vmem:[%s1010_s0 + $0x10] sm:$0xff]  ;;  %v804_v10 = vld [vmem:[%s1010_s0 + $0x18] sm:$0xff]  ;;  %v36_v14 = vrot.slane %v794_v8, 4  ;;  %v24_v33 = vcombine.high %v794_v8, %v794_v8 }
   0x4   :  { %v789_v7 = vld [vmem:[%s1010_s0] sm:$0xff]  ;;  %274 = vmatpush1.bf16.msra.mxu1 %v710_v6  ;;  %v67_v13 = vcombine.high %v799_v9, %v804_v10  ;;  %v716_v15 = vld [vmem:[%s1009_s1 + $0x68] sm:$0xff]   ;;  %v40_v17 = vrot.slane %v799_v9, 4  ;;  %v44_v21 = vrot.slane %v804_v10, 4  ;;  %v718_v22 = vld [vmem:[%s1009_s1 + $0x70] sm:$0xff]   ;;  %v25_v34 = vcombine.high %v799_v9, %v799_v9 }
   0x5   :  { %v65_v11 = vcombine.high %v789_v7, %v794_v8  ;;  %v32_v12 = vrot.slane %v789_v7, 4  ;;  %275 = vmatprep.subr.bf16.mxu1 %v742_v0  ;;  %v703_v18 = vld [vmem:[%s1009_s1 + $0x28] sm:$0xff]   ;;  %v37_v20 = vsel %vm31_vm0, %v36_v14, %v794_v8  ;;  %v704_v27 = vld [vmem:[%s1009_s1 + $0x30] sm:$0xff]   ;;  %v23_v28 = vcombine.high %v789_v7, %v789_v7  ;;  %v720_v30 = vld [vmem:[%s1009_s1 + $0x78] sm:$0xff]  }
   0x6   :  { %392 = vmatpush1.bf16.msra.mxu0 %v699_v2  ;;  %v41_v23 = vsel %vm31_vm0, %v40_v17, %v799_v9  ;;  %v45_v25 = vsel %vm31_vm0, %v44_v21, %v804_v10  ;;  %v50_v26 = vrot.slane %v37_v20, 4  ;;  %v705_v36 = vld [vmem:[%s1009_s1 + $0x38] sm:$0xff]   ;;  %v26_v37 = vcombine.high %v804_v10, %v804_v10  ;;  %v722_v40 = vld [vmem:[%s1009_s1 + $0x80] sm:$0xff]   ;;  %v724_v51 = vld [vmem:[%s1009_s1 + $0x88] sm:$0xff]  }
   0x7   :  { %393 = vmatprep.subr.bf16.mxu0 %v742_v0  ;;  %v33_v16 = vsel %vm31_vm0, %v32_v12, %v789_v7  ;;  %v73_v19 = vpack.c.bf16 %v67_v13, %v65_v11  ;;  %v52_v29 = vrot.slane %v41_v23, 4  ;;  %v54_v31 = vrot.slane %v45_v25, 4  ;;  %v706_v47 = vld [vmem:[%s1009_s1 + $0x40] sm:$0xff]   ;;  %v707_v55 = vld [vmem:[%s1009_s1 + $0x48] sm:$0xff]   ;;  %v726_v56 = vld [vmem:[%s1009_s1 + $0x90] sm:$0xff]  }
   0x8   :  { %276 = vmatpush1.bf16.msra.mxu1 %v716_v15  ;;  %v48_v24 = vrot.slane %v33_v16, 4  ;;  %v58_v35 = vsel %vm31_vm0, %v50_v26, %v794_v8  ;;  %vm92_vm6 = vmor %vm90_vm2, %vm91_vm3  ;;  %v708_v14 = vld [vmem:[%s1009_s1 + $0x50] sm:$0xff]   ;;  %v728_v15 = vld [vmem:[%s1009_s1 + $0x98] sm:$0xff]  }
   0x9   :  { %653 = vmatprep.mubr.msk.bf16.mxu0 %vm269_vm1, %v73_v19  ;;  %277 = vmatprep.subr.bf16.mxu1 %v742_v0  ;;  %v60_v38 = vsel %vm31_vm0, %v52_v29, %v799_v9  ;;  %v62_v41 = vsel %vm31_vm0, %v54_v31, %v804_v10  ;;  %v84_v43 = vcombine.low %v58_v35, %v24_v33  ;;  %vm121_vm7 = vmor %vm119_vm4, %vm120_vm5  ;;  %v709_v25 = vld [vmem:[%s1009_s1 + $0x58] sm:$0xff]   ;;  %v715_v26 = vld [vmem:[%s1009_s1 + $0xc0] sm:$0xff]  }
   0xa   :  { %394 = vmatpush1.bf16.msra.mxu0 %v700_v3  ;;  %v56_v32 = vsel %vm31_vm0, %v48_v24, %v789_v7  ;;  %v593_v44 = vcombine.high %v58_v35, %v794_v8  ;;  %v86_v45 = vcombine.low %v60_v38, %v25_v34  ;;  %v594_v46 = vcombine.high %v60_v38, %v799_v9  ;;  %v717_v29 = vld [vmem:[%s1009_s1 + $0xc8] sm:$0xff]   ;;  %v719_v33 = vld [vmem:[%s1009_s1 + $0xd0] sm:$0xff]   ;;  %v736_v34 = vld [vmem:[%s1009_s1 + $0xb8] sm:$0xff]  }
   0xb   :  { %395 = vmatprep.subr.bf16.mxu0 %v742_v0  ;;  %v861_v39 = vcombine.low %v56_v32, %v23_v28  ;;  %v592_v42 = vcombine.high %v56_v32, %v789_v7  ;;  %v88_v48 = vcombine.low %v62_v41, %v26_v37  ;;  %v595_v49 = vcombine.high %v62_v41, %v804_v10  ;;  %v723_v37 = vld [vmem:[%s1009_s1 + $0xe0] sm:$0xff]   ;;  %v725_v38 = vld [vmem:[%s1009_s1 + $0xe8] sm:$0xff]  }
   0xc   :  { %278 = vmatpush1.bf16.msra.mxu1 %v718_v22  ;;  %v597_v53 = vrot.slane %v84_v43, 11  ;;  %v99_v54 = vrot.slane %v593_v44, 7  ;;  %v598_v57 = vrot.slane %v86_v45, 11  ;;  %v103_v58 = vrot.slane %v594_v46, 7  ;;  %v731_v41 = vld [vmem:[%s1009_s1 + $0x100] sm:$0xff]  }
   0xd   :  { %279 = vmatprep.subr.bf16.mxu1 %v742_v0  ;;  %v596_v50 = vrot.slane %v861_v39, 11  ;;  %v95_v52 = vrot.slane %v592_v42, 7  ;;  %v599_v59 = vrot.slane %v88_v48, 11  ;;  %v107_v60 = vrot.slane %v595_v49, 7 }
   0xe   :  { %396 = vmatpush1.bf16.msra.mxu0 %v701_v4  ;;  %v600_v61 = vrot.slane %v861_v39, 9  ;;  %v124_v62 = vrot.slane %v592_v42, 5  ;;  %v601_v63 = vrot.slane %v84_v43, 9  ;;  %v128_v1 = vrot.slane %v593_v44, 5  ;;  %v727_v39 = vld [vmem:[%s1009_s1 + $0xf0] sm:$0xff]   ;;  %v733_v42 = vld [vmem:[%s1009_s1 + $0x108] sm:$0xff]  }
   0xf   :  { %397 = vmatprep.subr.bf16.mxu0 %v742_v0  ;;  %v602_v2 = vrot.slane %v86_v45, 9  ;;  %v132_v3 = vrot.slane %v594_v46, 5  ;;  %v603_v4 = vrot.slane %v88_v48, 9  ;;  %v96_v6 = vsel %vm92_vm6, %v596_v50, %v95_v52  ;;  %v735_v43 = vld [vmem:[%s1009_s1 + $0x110] sm:$0xff]   ;;  %v741_v46 = vld [vmem:[%s1009_s1 + $0x118] sm:$0xff]  }
  0x10   :  { %280 = vmatpush1.bf16.msra.mxu1 %v720_v30  ;;  %v100_v11 = vsel %vm92_vm6, %v597_v53, %v99_v54  ;;  %v104_v12 = vsel %vm92_vm6, %v598_v57, %v103_v58  ;;  %v108_v13 = vsel %vm92_vm6, %v599_v59, %v107_v60  ;;  %v66_v19 = vcombine.low %v799_v9, %v804_v10  ;;  %v734_v30 = vld [vmem:[%s1009_s1 + $0xb0] sm:$0xff]   ;;  %v579_v53 = vld [vmem:[%s1011_s2] sm:$0xf] }
  0x11   :  { %281 = vmatprep.subr.bf16.mxu1 %v742_v0  ;;  %v110_v16 = vcombine.high %v96_v6, %v100_v11  ;;  %v112_v17 = vcombine.high %v104_v12, %v108_v13  ;;  %v908_v20 = vsel %vm121_vm7, %v600_v61, %v124_v62  ;;  %v910_v22 = vsel %vm121_vm7, %v601_v63, %v128_v1 }
  0x12   :  { %398 = vmatpush1.bf16.msra.mxu0 %v702_v5  ;;  %v136_v5 = vrot.slane %v595_v49, 5  ;;  %v912_v23 = vsel %vm121_vm7, %v602_v2, %v132_v3  ;;  %v109_v31 = vcombine.low %v96_v6, %v100_v11  ;;  %v111_v32 = vcombine.low %v104_v12, %v108_v13 }
  0x13   :  { %399 = vmatprep.subr.bf16.mxu0 %v742_v0  ;;  %v118_v21 = vpack.c.bf16 %v112_v17, %v110_v16  ;;  %v138_v44 = vcombine.low %v908_v20, %v910_v22 }
  0x14   :  { %282 = vmatpush1.bf16.msra.mxu1 %v722_v40  ;;  %v914_v24 = vsel %vm121_vm7, %v603_v4, %v136_v5  ;;  %v117_v35 = vpack.c.bf16 %v111_v32, %v109_v31  ;;  %v729_v40 = vld [vmem:[%s1009_s1 + $0xf8] sm:$0xff]  }
  0x15   :  { %283 = vmatprep.subr.bf16.mxu1 %v742_v0  ;;  %640 = vmatprep.mubr.msk.bf16.mxu1 %vm269_vm1, %v118_v21  ;;  %v141_v9 = vcombine.high %v912_v23, %v914_v24  ;;  %v140_v45 = vcombine.low %v912_v23, %v914_v24 }
  0x16   :  { %400 = vmatpush1.bf16.msra.mxu0 %v703_v18  ;;  %v64_v18 = vcombine.low %v789_v7, %v794_v8  ;;  %v730_v7 = vld [vmem:[%s1009_s1 + $0xa0] sm:$0xff]   ;;  %v139_v8 = vcombine.high %v908_v20, %v910_v22 }
  0x17   :  { %401 = vmatprep.subr.bf16.mxu0 %v742_v0 }
  0x18   :  { %284 = vmatpush1.bf16.msra.mxu1 %v724_v51  ;;  %v72_v10 = vpack.c.bf16 %v66_v19, %v64_v18  ;;  %v147_v28 = vpack.c.bf16 %v141_v9, %v139_v8 }
  0x19   :  { %285 = vmatprep.subr.bf16.mxu1 %v742_v0 }
  0x1a   :  { %402 = vmatpush1.bf16.msra.mxu0 %v704_v27  ;;  %v732_v27 = vld [vmem:[%s1009_s1 + $0xa8] sm:$0xff]  }
  0x1b   :  { %403 = vmatprep.subr.bf16.mxu0 %v742_v0 }
  0x1c   :  { %286 = vmatpush1.bf16.msra.mxu1 %v726_v56 }
  0x1d   :  { %287 = vmatprep.subr.bf16.mxu1 %v742_v0 }
  0x1e   :  { %404 = vmatpush1.bf16.msra.mxu0 %v705_v36  ;;  %v721_v36 = vld [vmem:[%s1009_s1 + $0xd8] sm:$0xff]  }
  0x1f   :  { %405 = vmatprep.subr.bf16.mxu0 %v742_v0 }
  0x20   :  { %288 = vmatpush1.bf16.msra.mxu1 %v728_v15 }
  0x21   :  { %289 = vmatprep.subr.bf16.mxu1 %v742_v0 }
  0x22   :  { %406 = vmatpush1.bf16.msra.mxu0 %v706_v47  ;;  %v146_v47 = vpack.c.bf16 %v140_v45, %v138_v44 }
  0x23   :  { %407 = vmatprep.subr.bf16.mxu0 %v742_v0 }
  0x24   :  { %290 = vmatpush1.bf16.msra.mxu1 %v730_v7 }
  0x25   :  { %291 = vmatprep.subr.bf16.mxu1 %v742_v0 }
  0x26   :  { %408 = vmatpush1.bf16.msra.mxu0 %v707_v55 }
  0x27   :  { %409 = vmatprep.subr.bf16.mxu0 %v742_v0 }
  0x28   :  { %292 = vmatpush1.bf16.msra.mxu1 %v732_v27 }
  0x29   :  { %293 = vmatprep.subr.bf16.mxu1 %v742_v0 }
  0x2a   :  { %410 = vmatpush1.bf16.msra.mxu0 %v708_v14 }
  0x2b   :  { %411 = vmatprep.subr.bf16.mxu0 %v742_v0 }
  0x2c   :  { %294 = vmatpush1.bf16.msra.mxu1 %v734_v30 }
  0x2d   :  { %295 = vmatprep.subr.bf16.mxu1 %v742_v0 }
  0x2e   :  { %412 = vmatpush1.bf16.msra.mxu0 %v709_v25 }
  0x2f   :  { %530 = vmatprep.subr.bf16.mxu0 %v742_v0 }
  0x30   :  { %296 = vmatpush1.bf16.msra.mxu1 %v736_v34 }
  0x31   :  { %422 = vmatmul.mubr.bf16.vlgmr.msra.gmra.mrb[0].mxu0 %v72_v10 }
  0x32   :  { %531 = vmatpush1.bf16.msra.mxu0 %v715_v26  ;;  %690 = vmatprep.mubr.msk.bf16.mxu0 %vm269_vm1, %v147_v28 }
  0x33   :  { %532 = vmatprep.subr.bf16.mxu0 %v742_v0  ;;  %306 = vmatmul.mubr.bf16.vlgmr.msra.gmra.mrb[0].mxu1 %v117_v35 }
  0x36   :  { %533 = vmatpush1.bf16.msra.mxu0 %v717_v29 }
  0x37   :  { %534 = vmatprep.subr.bf16.mxu0 %v742_v0 }
  0x3a   :  { %535 = vmatpush1.bf16.msra.mxu0 %v719_v33 }
  0x3b   :  { %536 = vmatprep.subr.bf16.mxu0 %v742_v0 }
  0x3e   :  { %537 = vmatpush1.bf16.msra.mxu0 %v721_v36 }
  0x3f   :  { %538 = vmatprep.subr.bf16.mxu0 %v742_v0 }
  0x42   :  { %539 = vmatpush1.bf16.msra.mxu0 %v723_v37 }
  0x43   :  { %540 = vmatprep.subr.bf16.mxu0 %v742_v0 }
  0x46   :  { %541 = vmatpush1.bf16.msra.mxu0 %v725_v38 }
  0x47   :  { %542 = vmatprep.subr.bf16.mxu0 %v742_v0 }
  0x4a   :  { %543 = vmatpush1.bf16.msra.mxu0 %v727_v39 }
  0x4b   :  { %544 = vmatprep.subr.bf16.mxu0 %v742_v0 }
  0x4e   :  { %545 = vmatpush1.bf16.msra.mxu0 %v729_v40 }
  0x4f   :  { %546 = vmatprep.subr.bf16.mxu0 %v742_v0 }
  0x52   :  { %547 = vmatpush1.bf16.msra.mxu0 %v731_v41 }
  0x53   :  { %548 = vmatprep.subr.bf16.mxu0 %v742_v0 }
  0x56   :  { %549 = vmatpush1.bf16.msra.mxu0 %v733_v42 }
  0x57   :  { %550 = vmatprep.subr.bf16.mxu0 %v742_v0 }
  0x5a   :  { %551 = vmatpush1.bf16.msra.mxu0 %v735_v43 }
  0x5b   :  { %552 = vmatprep.subr.bf16.mxu0 %v742_v0 }
  0x5e   :  { %553 = vmatpush1.bf16.msra.mxu0 %v741_v46 }
  0x61   :  { %563 = vmatmul.mubr.bf16.vlgmr.msra.gmra.mrb[0].mxu0 %v146_v47 }
 0x106   :  { %v307_v48 = vpop.f32.mrb[0].mxu1 }
 0x107   :  { %v309_v49 = vpop.f32.mrb[1].mxu1 }
 0x108   :  { %v310_v50 = vpop.f32.mrb[2].mxu1 }
 0x109   :  { %v312_v51 = vpop.f32.mrb[3].mxu1 }
 0x134   :  { %v564_v52 = vpop.f32.mrb[0].mxu0 }
 0x135   :  { %v691_v54 = vadd.f32 %v564_v52, %v307_v48  ;;  %v566_v55 = vpop.f32.mrb[1].mxu0 }
 0x136   :  { %v567_v56 = vpop.f32.mrb[2].mxu0 }
 0x137   :  { %v575_v57 = vcombine.high %v691_v54, %v691_v54  ;;  %v580_v58 = vadd.f32 %v691_v54, %v579_v53  ;;  %v692_v59 = vadd.f32 %v567_v56, %v310_v50  ;;  %v569_v60 = vpop.f32.mrb[3].mxu0 }
 0x139   :  { %v581_v0 = vadd.f32 %v579_v53, %v575_v57  ;;  %584 = vst [vmem:[%s1012_s3] sm:$0xf] %v580_v58  ;;  %v576_v61 = vcombine.high %v692_v59, %v692_v59  ;;  %v582_v62 = vadd.f32 %v692_v59, %v579_v53 }
 0x13b   :  { %585 = vst [vmem:[%s1012_s3 + $0x4] sm:$0xf] %v581_v0  ;;  %v583_v63 = vadd.f32 %v579_v53, %v576_v61  ;;  %586 = vst [vmem:[%s1012_s3 + $0x8] sm:$0xf] %v582_v62 }
 0x13d   :  { %587 = vst [vmem:[%s1012_s3 + $0xc] sm:$0xf] %v583_v63 }

</bundles_post_ra>
